<compile_context>
chip_gen: v5e
topology: v5e:2x2
jax: 0.10.0
libtpu: 0.0.40
codegen_flags: <defaults>
</compile_context>

<pallas_src>
import functools
import math

import jax
import jax.numpy as jnp
from jax import lax
from jax.experimental import pallas as pl
from jax.experimental.pallas import tpu as pltpu


# --------------------------------------------------------------------------
# Helpers
# --------------------------------------------------------------------------
def _round_up(a, b):
    return ((a + b - 1) // b) * b


def _sublane_align(dtype):
    return {1: 32, 2: 16, 4: 8}[jnp.dtype(dtype).itemsize]


def _pick_lane_tile(dim, max_tile):
    """Tile for a lane (last) dim that must stay a multiple of 128.

    Returns (tile, padded_dim) with tile % 128 == 0, tile | padded_dim.
    Padding may exceed round_up(dim, 128) so a large tile is always usable.
    """
    max_tile = max(128, (max_tile // 128) * 128)
    padded = _round_up(dim, 128)
    if padded <= max_tile:
        return padded, padded
    tile = max_tile
    return tile, _round_up(dim, tile)


def _pick_contract_tile(dim, max_tile):
    """Tile for the K (reduction) dim. Full-dim block needs no padding."""
    if dim <= max_tile:
        return dim, dim
    tile = max(128, (max_tile // 128) * 128)
    return tile, _round_up(dim, tile)


def _pick_row_tile(m, max_tile, align):
    """Tile for the M (rows) dim; cdiv grid, so no divisibility needed."""
    if m <= max_tile:
        return m
    return max(align, (max_tile // align) * align)


def _vmem_budget_bytes():
    """~75% of per-core VMEM; conservative fallback fits v7x (64 MiB/TC)."""
    try:
        info = pltpu.get_tpu_info()
        cap = getattr(info, "vmem_capacity_bytes", None)
        if cap:
            return int(cap) * 3 // 4
    except Exception:
        pass
    return 48 * 1024 * 1024


# --------------------------------------------------------------------------
# Kernels
# --------------------------------------------------------------------------
def _epilogue(acc_f32, b_row, use_gelu, gelu_approx):
    y = acc_f32 + b_row.astype(jnp.float32)
    if use_gelu:
        if gelu_approx:
            c = jnp.float32(0.7978845608028654)  # sqrt(2/pi)
            y = 0.5 * y * (1.0 + jnp.tanh(c * (y + 0.044715 * y * y * y)))
        else:
            # nn.GELU() default: exact erf-based GELU.
            y = 0.5 * y * (1.0 + lax.erf(y * jnp.float32(0.7071067811865476)))
    return y


def _fc_kernel_f32_out(x_ref, w_ref, b_ref, o_ref, *, use_gelu, gelu_approx):
    """f32 output: accumulate directly into o_ref (no scratch)."""
    k = pl.program_id(2)

    @pl.when(k == 0)
    def _():
        o_ref[...] = jnp.zeros_like(o_ref)

    o_ref[...] += jnp.dot(x_ref[...], w_ref[...],
                          preferred_element_type=jnp.float32)

    @pl.when(k == pl.num_programs(2) - 1)
    def _():
        o_ref[...] = _epilogue(o_ref[...], b_ref[...], use_gelu, gelu_approx)


def _fc_kernel_scratch(x_ref, w_ref, b_ref, o_ref, acc_ref, *,
                       use_gelu, gelu_approx):
    """Low-precision output: f32 VMEM scratch accumulator."""
    k = pl.program_id(2)

    @pl.when(k == 0)
    def _():
        acc_ref[...] = jnp.zeros_like(acc_ref)

    acc_ref[...] += jnp.dot(x_ref[...], w_ref[...],
                            preferred_element_type=jnp.float32)

    @pl.when(k == pl.num_programs(2) - 1)
    def _():
        y = _epilogue(acc_ref[...], b_ref[...], use_gelu, gelu_approx)
        o_ref[...] = y.astype(o_ref.dtype)


# --------------------------------------------------------------------------
# One-time parameter preparation (hoisted out of the per-call path)
# --------------------------------------------------------------------------
def prepare_fc_params(weight, bias, *, matmul_dtype=jnp.bfloat16,
                      max_tn=1024, max_tk=1024):
    """Transpose / pad / cast the FC weights once.

    weight: [out_size, in_size] (PyTorch nn.Linear layout)
    bias:   [out_size]
    matmul_dtype: MXU operand dtype (bf16 default; None keeps weight dtype).
    """
    out_size, in_size = weight.shape
    tn, n_pad = _pick_lane_tile(out_size, max_tn)
    tk, k_pad = _pick_contract_tile(in_size, max_tk)

    w = weight.T  # [in_size, out_size]
    if matmul_dtype is not None:
        w = w.astype(matmul_dtype)
    if (k_pad, n_pad) != (in_size, out_size):
        w = jnp.pad(w, ((0, k_pad - in_size), (0, n_pad - out_size)))

    b = bias.reshape(1, out_size).astype(jnp.float32)
    if n_pad != out_size:
        b = jnp.pad(b, ((0, 0), (0, n_pad - out_size)))

    return dict(w=w, b=b, in_size=in_size, out_size=out_size,
                k_pad=k_pad, n_pad=n_pad, tk=tk, tn=tn,
                matmul_dtype=matmul_dtype)


# --------------------------------------------------------------------------
# Forward
# --------------------------------------------------------------------------
def fc_forward(x, params, *, use_gelu=True, pdrop=0.0, gelu_approx=False,
               max_tm=512, w_buffer_count=None):
    """Pallas FC forward: gelu(x @ W.T + b), matching nn.Linear(+GELU).

    x: [..., in_size].  `params` comes from prepare_fc_params().
    """
    # TODO(synk): training-mode dropout (pdrop > 0) would need
    # pltpu.prng_seed / prng_random_bits masking; forward matches eval.
    del pdrop

    in_size = params["in_size"]
    out_size = params["out_size"]
    k_pad = params["k_pad"]
    n_pad = params["n_pad"]
    tk = params["tk"]
    tn = params["tn"]
    w = params["w"]
    b = params["b"]
    matmul_dtype = params["matmul_dtype"]

    out_dtype = x.dtype
    lead = x.shape[:-1]
    m = math.prod(lead) if lead else 1
    x2 = x.reshape(m, in_size)
    if matmul_dtype is not None and x2.dtype != jnp.dtype(matmul_dtype):
        x2 = x2.astype(matmul_dtype)
    if k_pad != in_size:                       # only K needs zero padding
        x2 = jnp.pad(x2, ((0, 0), (0, k_pad - in_size)))

    op_dtype = x2.dtype
    align = _sublane_align(op_dtype)
    tm = _pick_row_tile(m, max_tm, align)

    gm = pl.cdiv(m, tm)
    gn = n_pad // tn

    # Megacore (v7x, 2 TCs): make sure a "parallel" axis has >= 2 blocks.
    if gm * gn < 2:
        cands = [d for d in range(128, tn, 128) if n_pad % d == 0]
        if cands:
            tn = max(cands)
            gn = n_pad // tn

    f32_out = jnp.dtype(out_dtype) == jnp.dtype(jnp.float32)
    w_bufs = int(w_buffer_count) if w_buffer_count else 2
    in_item = jnp.dtype(op_dtype).itemsize
    out_item = jnp.dtype(out_dtype).itemsize

    def vmem_need(tm_, tn_, tk_):
        total = 2 * tm_ * tk_ * in_item          # x blocks (double buffered)
        total += w_bufs * tk_ * tn_ * in_item    # weight blocks
        total += 2 * tn_ * 4                     # bias blocks (f32)
        total += 2 * tm_ * tn_ * out_item        # output blocks
        if not f32_out:
            total += tm_ * tn_ * 4               # acc scratch
        return total

    # Keep tiles within the per-core VMEM budget (v7x has only 64 MiB/TC).
    budget = _vmem_budget_bytes()
    while vmem_need(tm, tn, tk) > budget:
        if tk >= 256 and tk % 256 == 0 and k_pad % (tk // 2) == 0:
            tk //= 2
        elif tn >= 256 and tn % 256 == 0 and n_pad % (tn // 2) == 0:
            tn //= 2
        elif tm > align and tm % (2 * align) == 0:
            tm //= 2
        else:
            break

    gm = pl.cdiv(m, tm)
    gn = n_pad // tn
    gk = k_pad // tk
    grid = (gm, gn, gk)

    need = vmem_need(tm, tn, tk)
    vmem_limit = int(max(need, min(budget,
                                   max(need * 5 // 4, 32 * 1024 * 1024))))

    if w_buffer_count and w_buffer_count != 2:
        w_spec = pl.BlockSpec((tk, tn), lambda i, j, k: (k, j),
                              pipeline_mode=pl.Buffered(w_buffer_count))
    else:
        w_spec = pl.BlockSpec((tk, tn), lambda i, j, k: (k, j))

    if f32_out:
        kernel = functools.partial(_fc_kernel_f32_out, use_gelu=use_gelu,
                                   gelu_approx=gelu_approx)
        scratch_shapes = []
    else:
        kernel = functools.partial(_fc_kernel_scratch, use_gelu=use_gelu,
                                   gelu_approx=gelu_approx)
        scratch_shapes = [pltpu.VMEM((tm, tn), jnp.float32)]

    cost = pl.CostEstimate(
        flops=2 * m * in_size * out_size,
        transcendentals=m * out_size if use_gelu else 0,
        bytes_accessed=(gn * m * k_pad * in_item        # x re-read per N block
                        + gm * k_pad * n_pad * in_item  # W re-read per M block
                        + n_pad * 4
                        + m * n_pad * out_item),
    )

    out = pl.pallas_call(
        kernel,
        out_shape=jax.ShapeDtypeStruct((m, n_pad), out_dtype),
        grid_spec=pltpu.PrefetchScalarGridSpec(
            num_scalar_prefetch=0,
            grid=grid,
            in_specs=[
                pl.BlockSpec((tm, tk), lambda i, j, k: (i, k)),
                w_spec,
                pl.BlockSpec((1, tn), lambda i, j, k: (0, j)),
            ],
            out_specs=pl.BlockSpec((tm, tn), lambda i, j, k: (i, j)),
            scratch_shapes=scratch_shapes,
        ),
        compiler_params=pltpu.CompilerParams(
            dimension_semantics=("parallel", "parallel", "arbitrary"),
            vmem_limit_bytes=vmem_limit),
        cost_estimate=cost,
    )(x2, w, b)

    if n_pad != out_size:
        out = out[:, :out_size]
    return out.reshape(*lead, out_size)


# --------------------------------------------------------------------------
# Reference & self-test
# --------------------------------------------------------------------------
def _ref_fc(x, weight, bias, use_gelu=True):
    y = jnp.einsum("...i,oi->...o", x, weight) + bias
    if use_gelu:
        y = 0.5 * y * (1.0 + lax.erf(y / jnp.sqrt(2.0)))
    return y


if __name__ == "__main__":
    key = jax.random.PRNGKey(0)
    k_x, k_w, k_b, k_x2, k_w2, k_b2 = jax.random.split(key, 6)

    # ---- case 1: small demo shape (batch=2, seq=8, in=32, out=64) ----
    batch, seq, in_size, out_size = 2, 8, 32, 64
    x = jax.random.normal(k_x, (batch, seq, in_size), dtype=jnp.float32)
    bound = 1.0 / math.sqrt(in_size)
    weight = jax.random.uniform(k_w, (out_size, in_size),
                                minval=-bound, maxval=bound,
                                dtype=jnp.float32)
    bias = jax.random.uniform(k_b, (out_size,),
                              minval=-bound, maxval=bound, dtype=jnp.float32)
    ref = _ref_fc(x, weight, bias, use_gelu=True)

    # Exact f32-operand path (strict check).
    params_f32 = prepare_fc_params(weight, bias, matmul_dtype=None)
    out_f32 = jax.block_until_ready(
        fc_forward(x, params_f32, use_gelu=True, pdrop=0.0))
    assert out_f32.shape == (batch, seq, out_size)
    assert jnp.allclose(out_f32, ref, atol=1e-5, rtol=1e-5)

    # Default bf16 MXU-operand path (f32 accumulation), looser tolerance.
    params_bf16 = prepare_fc_params(weight, bias)  # bf16 operands by default
    out_bf16 = jax.block_until_ready(
        fc_forward(x, params_bf16, use_gelu=True, pdrop=0.0))
    assert out_bf16.shape == (batch, seq, out_size)
    assert jnp.allclose(out_bf16, ref, atol=5e-2, rtol=5e-2)

    # ---- case 2: multi-block (M, N, K) grid exercising accumulation ----
    b2, s2, in2, out2 = 4, 96, 256, 512
    x2 = jax.random.normal(k_x2, (b2, s2, in2), dtype=jnp.float32)
    bound2 = 1.0 / math.sqrt(in2)
    w2 = jax.random.uniform(k_w2, (out2, in2),
                            minval=-bound2, maxval=bound2, dtype=jnp.float32)
    bias2 = jax.random.uniform(k_b2, (out2,),
                               minval=-bound2, maxval=bound2,
                               dtype=jnp.float32)
    params2 = prepare_fc_params(w2, bias2, max_tn=256, max_tk=128)
    out2_k = jax.block_until_ready(
        fc_forward(x2, params2, use_gelu=True, pdrop=0.0, max_tm=128))
    ref2 = _ref_fc(x2, w2, bias2, use_gelu=True)
    assert out2_k.shape == (b2, s2, out2)
    assert jnp.allclose(out2_k, ref2, atol=5e-2, rtol=5e-2)

    print("KERNEL_OK")
</pallas_src>

<mosaic_0001>
module attributes {stable_mosaic.version = 11 : i64} {
  func.func @_fc_kernel_f32_out(%arg0: i32, %arg1: i32, %arg2: i32, %arg3: memref<16x32xf32, #tpu.memory_space<vmem>>, %arg4: memref<32x128xf32, #tpu.memory_space<vmem>>, %arg5: memref<1x128xf32, #tpu.memory_space<vmem>>, %arg6: memref<16x128xf32, #tpu.memory_space<vmem>>) attributes {dimension_semantics = [#tpu.dimension_semantics<parallel>, #tpu.dimension_semantics<parallel>, #tpu.dimension_semantics<arbitrary>], iteration_bounds = array<i64: 1, 1, 1>, scalar_prefetch = 0 : i64, scratch_operands = 0 : i64, tpu.core_type = #tpu.core_type<tc>, window_params = [{transform_indices = @transform_0, window_bounds = array<i64: 16, 32>}, {transform_indices = @transform_1, window_bounds = array<i64: 32, 128>}, {transform_indices = @transform_2, window_bounds = array<i64: 1, 128>}, {transform_indices = @transform_3, window_bounds = array<i64: 16, 128>}]} {
    %c0_i32 = arith.constant 0 : i32
    %0 = arith.cmpi eq, %arg2, %c0_i32 : i32
    %1 = arith.extui %0 : i1 to i32
    %c0_i32_0 = arith.constant 0 : i32
    %2 = arith.cmpi ne, %1, %c0_i32_0 : i32
    scf.if %2 {
      %cst_10 = arith.constant 0.000000e+00 : f32
      %12 = vector.broadcast %cst_10 : f32 to vector<16x128xf32>
      %c0_11 = arith.constant 0 : index
      %c0_12 = arith.constant 0 : index
      %13 = vector.load %arg6[%c0_11, %c0_12] : memref<16x128xf32, #tpu.memory_space<vmem>>, vector<16x128xf32>
      tpu.vector_store %arg6[%c0_11, %c0_12], %12 {strides = array<i32>} : memref<16x128xf32, #tpu.memory_space<vmem>>, vector<16x128xf32>,
    } else {
    }
    %c0 = arith.constant 0 : index
    %c0_1 = arith.constant 0 : index
    %3 = vector.load %arg6[%c0, %c0_1] : memref<16x128xf32, #tpu.memory_space<vmem>>, vector<16x128xf32>
    %c0_2 = arith.constant 0 : index
    %c0_3 = arith.constant 0 : index
    %4 = vector.load %arg3[%c0_2, %c0_3] : memref<16x32xf32, #tpu.memory_space<vmem>>, vector<16x32xf32>
    %c0_4 = arith.constant 0 : index
    %c0_5 = arith.constant 0 : index
    %5 = vector.load %arg4[%c0_4, %c0_5] : memref<32x128xf32, #tpu.memory_space<vmem>>, vector<32x128xf32>
    %cst = arith.constant dense<0.000000e+00> : vector<16x128xf32>
    %6 = tpu.matmul %4, %5, %cst {dimension_numbers = #tpu.dot_dimension_numbers<[1], [0], [0], [1], [0, 0, 1, 1], [], []>} : vector<16x32xf32>, vector<32x128xf32>, vector<16x128xf32> -> vector<16x128xf32>
    %7 = arith.addf %3, %6 : vector<16x128xf32>
    %c0_6 = arith.constant 0 : index
    %c0_7 = arith.constant 0 : index
    %8 = vector.load %arg6[%c0_6, %c0_7] : memref<16x128xf32, #tpu.memory_space<vmem>>, vector<16x128xf32>
    tpu.vector_store %arg6[%c0_6, %c0_7], %7 {strides = array<i32>} : memref<16x128xf32, #tpu.memory_space<vmem>>, vector<16x128xf32>,
    %c0_i32_8 = arith.constant 0 : i32
    %9 = arith.cmpi eq, %arg2, %c0_i32_8 : i32
    %10 = arith.extui %9 : i1 to i32
    %c0_i32_9 = arith.constant 0 : i32
    %11 = arith.cmpi ne, %10, %c0_i32_9 : i32
    scf.if %11 {
      %c0_10 = arith.constant 0 : index
      %c0_11 = arith.constant 0 : index
      %12 = vector.load %arg6[%c0_10, %c0_11] : memref<16x128xf32, #tpu.memory_space<vmem>>, vector<16x128xf32>
      %c0_12 = arith.constant 0 : index
      %c0_13 = arith.constant 0 : index
      %13 = vector.load %arg5[%c0_12, %c0_13] : memref<1x128xf32, #tpu.memory_space<vmem>>, vector<1x128xf32>
      %14 = vector.broadcast %13 : vector<1x128xf32> to vector<16x128xf32>
      %15 = arith.addf %12, %14 : vector<16x128xf32>
      %cst_14 = arith.constant 5.000000e-01 : f32
      %16 = vector.broadcast %cst_14 : f32 to vector<16x128xf32>
      %17 = arith.mulf %16, %15 : vector<16x128xf32>
      %cst_15 = arith.constant 0.707106769 : f32
      %18 = vector.broadcast %cst_15 : f32 to vector<16x128xf32>
      %19 = arith.mulf %15, %18 : vector<16x128xf32>
      %20 = math.erf %19 : vector<16x128xf32>
      %cst_16 = arith.constant 1.000000e+00 : f32
      %21 = vector.broadcast %cst_16 : f32 to vector<16x128xf32>
      %22 = arith.addf %21, %20 : vector<16x128xf32>
      %23 = arith.mulf %17, %22 : vector<16x128xf32>
      %c0_17 = arith.constant 0 : index
      %c0_18 = arith.constant 0 : index
      %24 = vector.load %arg6[%c0_17, %c0_18] : memref<16x128xf32, #tpu.memory_space<vmem>>, vector<16x128xf32>
      tpu.vector_store %arg6[%c0_17, %c0_18], %23 {strides = array<i32>} : memref<16x128xf32, #tpu.memory_space<vmem>>, vector<16x128xf32>,
    } else {
    }
    return
  }
  func.func @transform_0(%arg0: i32, %arg1: i32, %arg2: i32) -> (i32, i32) {
    %c0_i32 = arith.constant 0 : i32
    return %arg0, %arg2 : i32, i32
  }
  func.func @transform_1(%arg0: i32, %arg1: i32, %arg2: i32) -> (i32, i32) {
    %c0_i32 = arith.constant 0 : i32
    return %arg2, %arg1 : i32, i32
  }
  func.func @transform_2(%arg0: i32, %arg1: i32, %arg2: i32) -> (i32, i32) {
    %c0_i32 = arith.constant 0 : i32
    %c0_i32_0 = arith.constant 0 : i32
    return %c0_i32, %arg1 : i32, i32
  }
  func.func @transform_3(%arg0: i32, %arg1: i32, %arg2: i32) -> (i32, i32) {
    %c0_i32 = arith.constant 0 : i32
    return %arg0, %arg1 : i32, i32
  }
}

</mosaic_0001>

<bundles_post_ra>
// kernel: tpu_custom_call.1
= control target key start
LH: loop header
LB: loop body
LE: loop exit
PB: predicated region body
PF: predicated region fallthrough
CT: control target
= control target key end

     0   :  { %8 = vsyncpa [#allocation3], 0  ;;  %s377_s0 = inlined_call_operand.hbm [shape: f32[16,32], index: 0, kind: input, shape index: {}]   ;;  %s378_s1 = inlined_call_operand.hbm [shape: f32[32,128], index: 1, kind: input, shape index: {}]   ;;  %s379_s2 = inlined_call_operand.vmem [shape: f32[1,128], index: 2, kind: input, shape index: {}]   ;;  %s380_s3 = inlined_call_operand.hbm [shape: f32[16,128], index: 3, kind: output, shape index: {}]  }
   0x1   :  { %9 = vsyncpa [#allocation6], 0 }
   0x2   :  { %10 = vsyncpa [#allocation4], 0  ;;  %s15_s14 = sshll.u32 %s377_s0, 4  ;;  %s313_s15 = smov [#allocation2]   ;;  %s16_s14 = int_to_ptr.hbm [resolvable:$true] %s15_s14 }
   0x3   :  { %s17_s16 = sshll.u32 %s313_s15, 4  ;;  %s28_s19 = sshll.u32 %s378_s1, 4  ;;  %s18_s16 = int_to_ptr.vmem [resolvable:$true] %s17_s16  ;;  %s29_s19 = int_to_ptr.hbm [resolvable:$true] %s28_s19 }
   0x4   :  { %s314_s20 = smov 128   ;;  %s315_s21 = smov 8  }
   0x5   :  { %23 = dma.hbm_to_vmem [thread:$0]  %s16_s14, 256, %s18_s16, [#allocation3], %s314_s20, %s314_s20, %s315_s21  }
   0x6   :  { %s316_s22 = smov [#allocation5]  }
   0x7   :  { %s30_s23 = sshll.u32 %s316_s22, 4  ;;  %s31_s23 = int_to_ptr.vmem [resolvable:$true] %s30_s23 }
   0x8   :  { %36 = dma.hbm_to_vmem [thread:$0]  %s29_s19, 512, %s31_s23, [#allocation6], %s314_s20, %s314_s20, %s315_s21  }
   0x9   :  { %307 = dma.done.wait [#allocation3], 256  }
   0xa   :  { %308 = vsyncadd [#allocation3], 4294967040 }
   0xb   :  { %309 = dma.done.wait [#allocation6], 512  }
   0xc   :  { %310 = vsyncadd [#allocation6], 4294966784  ;;  %v60_v0 = vld [vmem:[#allocation5 + $0x18] sm:$0xff]  ;;  %v59_v1 = vld [vmem:[#allocation5 + $0x10] sm:$0xff]  ;;  %vm61_vm0 = vcmask 261120   ;;  %s202_s27 = sshll.u32 %s380_s3, 4  ;;  %s203_s27 = int_to_ptr.hbm [resolvable:$true] %s202_s27 }
   0xd   :  { %80 = vmatpush.msra.mxu0 %v60_v0  ;;  %220 = vmatpush.msra.mxu1 %v60_v0  ;;  %v58_v2 = vld [vmem:[#allocation5 + $0x8] sm:$0xff]  ;;  %v57_v3 = vld [vmem:[#allocation5] sm:$0xff]  ;;  %v55_v4 = vld [vmem:[#allocation2] sm:$0xff] }
   0xe   :  { %v56_v5 = vld [vmem:[#allocation2 + $0x8] sm:$0xff]  ;;  %v230_v6 = vld [vmem:[%s379_s2] ss:$0 sm:$0xff]  ;;  %s317_s2 = smov [#allocation7]  }
   0xf   :  { %81 = vmatpush.msra.mxu0 %v59_v1  ;;  %221 = vmatpush.msra.mxu1 %v59_v1  ;;  %s200_s24 = sshll.u32 %s317_s2, 4  ;;  %s201_s24 = int_to_ptr.vmem [resolvable:$true] %s200_s24 }
  0x11   :  { %82 = vmatpush.msra.mxu0 %v58_v2  ;;  %222 = vmatpush.msra.mxu1 %v58_v2 }
  0x13   :  { %83 = vmatpush.msra.mxu0 %v57_v3  ;;  %223 = vmatpush.msra.mxu1 %v57_v3 }
  0x14   :  { %216 = vmatmul.msk.f32.vlgmr.msra.gmra.mxu0 %vm61_vm0, %v55_v4  ;;  %217 = vmatmul.msk.f32.vlgmr.msra.gmra.mxu1 %vm61_vm0, %v56_v5 }
  0x91   :  { %v85_v7 = vpop.f32.mrf.mxu0  ;;  %v88_v8 = vpop.f32.mrf.mxu1 }
  0x92   :  { %v353_v9 = vadd.f32 %v230_v6, %v85_v7  ;;  %v355_v10 = vadd.f32 %v230_v6, %v88_v8 }
  0x94   :  { %v358_v11 = vmul.f32 0.70710677, %v353_v9  ;;  %v361_v12 = vmul.f32 0.70710677, %v355_v10 }
  0x96   :  { %v110_v13 = vmul.f32 %v358_v11, %v358_v11  ;;  %v150_v14 = vmul.f32 %v361_v12, %v361_v12 }
  0x98   :  { %v111_v15 = vmin.f32 %v110_v13, 16.0  ;;  %v151_v16 = vmin.f32 %v150_v14, 16.0 }
  0x9a   :  { %v112_v17 = vmul.f32 2.1237322e-06, %v111_v15  ;;  %v123_v18 = vmul.f32 3.8918573e-05, %v111_v15  ;;  %v152_v19 = vmul.f32 2.1237322e-06, %v151_v16 }
  0x9b   :  { %v163_v20 = vmul.f32 3.8918573e-05, %v151_v16 }
  0x9c   :  { %v113_v21 = vadd.f32 0.00028619796, %v112_v17  ;;  %v124_v22 = vadd.f32 0.001143296, %v123_v18  ;;  %v153_v23 = vadd.f32 0.00028619796, %v152_v19 }
  0x9d   :  { %v164_v24 = vadd.f32 0.001143296, %v163_v20 }
  0x9e   :  { %v114_v25 = vmul.f32 %v113_v21, %v111_v15  ;;  %v125_v26 = vmul.f32 %v124_v22, %v111_v15  ;;  %v154_v27 = vmul.f32 %v153_v23, %v151_v16  ;;  %v106_v23 = vmul.f32 0.5, %v353_v9 }
  0x9f   :  { %v165_v28 = vmul.f32 %v164_v24, %v151_v16 }
  0xa0   :  { %v115_v29 = vadd.f32 0.0036580483, %v114_v25  ;;  %v126_v30 = vadd.f32 0.014752088, %v125_v26  ;;  %v155_v33 = vadd.f32 0.0036580483, %v154_v27 }
  0xa1   :  { %v166_v31 = vadd.f32 0.014752088, %v165_v28 }
  0xa2   :  { %v127_v32 = vmul.f32 %v126_v30, %v111_v15  ;;  %v116_v35 = vmul.f32 %v115_v29, %v111_v15  ;;  %v156_v39 = vmul.f32 %v155_v33, %v151_v16 }
  0xa3   :  { %v167_v34 = vmul.f32 %v166_v31, %v151_v16 }
  0xa4   :  { %v128_v36 = vadd.f32 0.112945676, %v127_v32  ;;  %v117_v41 = vadd.f32 0.05243302, %v116_v35  ;;  %v157_v45 = vadd.f32 0.05243302, %v156_v39 }
  0xa5   :  { %v168_v37 = vadd.f32 0.112945676, %v167_v34 }
  0xa6   :  { %v129_v38 = vmul.f32 %v128_v36, %v111_v15  ;;  %v118_v47 = vmul.f32 %v117_v41, %v111_v15  ;;  %v158_v50 = vmul.f32 %v157_v45, %v151_v16 }
  0xa7   :  { %v169_v40 = vmul.f32 %v168_v37, %v151_v16 }
  0xa8   :  { %v130_v42 = vadd.f32 0.4994258, %v129_v38  ;;  %v119_v51 = vadd.f32 0.18741608, %v118_v47  ;;  %v159_v52 = vadd.f32 0.18741608, %v158_v50 }
  0xa9   :  { %v170_v43 = vadd.f32 0.4994258, %v169_v40 }
  0xaa   :  { %v131_v44 = vmul.f32 %v130_v42, %v111_v15  ;;  %v120_v54 = vmul.f32 %v119_v51, %v111_v15  ;;  %v160_v57 = vmul.f32 %v159_v52, %v151_v16 }
  0xab   :  { %v171_v46 = vmul.f32 %v170_v43, %v151_v16 }
  0xac   :  { %v132_v48 = vadd.f32 1.0, %v131_v44  ;;  %v121_v60 = vadd.f32 1.1283791, %v120_v54  ;;  %v161_v2 = vadd.f32 1.1283791, %v160_v57 }
  0xad   :  { %v172_v49 = vadd.f32 1.0, %v171_v46 }
  0xae   :  { %231 = vrcp.f32 %v132_v48  ;;  %v144_v61 = vand.u32 2147483648, %v132_v48  ;;  %v142_v0 = vand.u32 2147483647, %v132_v48  ;;  %vm138_vm3 = vweird.f32 %v132_v48 }
  0xaf   :  { %233 = vrcp.f32 %v172_v49  ;;  %v184_v1 = vand.u32 2147483648, %v172_v49  ;;  %v182_v4 = vand.u32 2147483647, %v172_v49  ;;  %vm178_vm5 = vweird.f32 %v172_v49 }
  0xb0   :  { %v145_v6 = vor.u32 1.1754944e-38, %v144_v61  ;;  %v122_v8 = vmul.f32 %v121_v60, %v358_v11  ;;  %vm143_vm6 = vcmp.eq.f32.partialorder %v142_v0, 8.507059e+37  ;;  %v162_v16 = vmul.f32 %v161_v2, %v361_v12 }
  0xb1   :  { %v185_v14 = vor.u32 1.1754944e-38, %v184_v1  ;;  %vm183_vm8 = vcmp.eq.f32.partialorder %v182_v4, 8.507059e+37  ;;  %v107_v11 = vmul.f32 0.5, %v355_v10 }
  0xb4   :  { %v232_v53 = vpop.eup %231 }
  0xb5   :  { %v234_v55 = vpop.eup %233  ;;  %v134_v56 = vmul.f32 %v232_v53, %v132_v48  ;;  %vm139_vm1 = vweird.f32 %v232_v53 }
  0xb6   :  { %v174_v58 = vmul.f32 %v234_v55, %v172_v49  ;;  %vm179_vm2 = vweird.f32 %v234_v55  ;;  %vm140_vm4 = vmor %vm138_vm3, %vm139_vm1 }
  0xb7   :  { %v135_v59 = vsub.f32 1.0, %v134_v56  ;;  %vm180_vm7 = vmor %vm178_vm5, %vm179_vm2 }
  0xb8   :  { %v175_v62 = vsub.f32 1.0, %v174_v58 }
  0xb9   :  { %v136_v63 = vmul.f32 %v232_v53, %v135_v59 }
  0xba   :  { %v176_v3 = vmul.f32 %v234_v55, %v175_v62 }
  0xbb   :  { %v137_v5 = vadd.f32 %v232_v53, %v136_v63 }
  0xbc   :  { %v177_v7 = vadd.f32 %v234_v55, %v176_v3 }
  0xbd   :  { %v141_v13 = vsel %vm140_vm4, %v232_v53, %v137_v5 }
  0xbe   :  { %v146_v15 = vsel %vm143_vm6, %v145_v6, %v141_v13  ;;  %v181_v17 = vsel %vm180_vm7, %v234_v55, %v177_v7 }
  0xbf   :  { %v147_v18 = vmul.f32 %v146_v15, %v122_v8  ;;  %v186_v19 = vsel %vm183_vm8, %v185_v14, %v181_v17 }
  0xc0   :  { %v187_v20 = vmul.f32 %v186_v19, %v162_v16 }
  0xc1   :  { %v218_v21 = vclamps-f32 %v147_v18, 1.0 }
  0xc2   :  { %v219_v22 = vclamps-f32 %v187_v20, 1.0 }
  0xc3   :  { %v190_v24 = vadd.f32 1.0, %v218_v21 }
  0xc4   :  { %v191_v25 = vadd.f32 1.0, %v219_v22 }
  0xc5   :  { %v192_v12 = vmul.f32 %v190_v24, %v106_v23 }
  0xc6   :  { %v193_v26 = vmul.f32 %v191_v25, %v107_v11 }
  0xc7   :  { %194 = vst [vmem:[#allocation7] sm:$0xff] %v192_v12 }
  0xc8   :  { %195 = vst [vmem:[#allocation7 + $0x8] sm:$0xff] %v193_v26 }
  0xc9   :  { %208 = dma.vmem_to_hbm [thread:$0]  %s201_s24, 256, %s203_s27, [#allocation4], %s314_s20, %s314_s20, %s315_s21  }
  0xca   :  { %311 = dma.done.wait [#allocation4], 256  }
  0xcb   :  { %312 = vsyncadd [#allocation4], 4294967040 }
  0xcc   :  { %213 = vsyncpa [#allocation3], 1 }
  0xcd   :  { %214 = vsyncpa [#allocation6], 1 }
  0xce   :  { %215 = vsyncpa [#allocation4], 1 }

</bundles_post_ra>
